<compile_context>
chip_gen: v7x
topology: tpu7x:2x2x1
jax: 0.10.0
libtpu: 0.0.40
codegen_flags: <defaults>
</compile_context>

<pallas_src>
import functools

import jax
import jax.numpy as jnp
from jax.experimental import pallas as pl
from jax.experimental.pallas import tpu as pltpu

VMEM_LIMIT_BYTES = 32 * 1024 * 1024


def _round_up(n, m):
    return ((n + m - 1) // m) * m


def _pad2(a, rows, cols):
    return jnp.pad(a, ((0, rows - a.shape[0]), (0, cols - a.shape[1])))


def _pick_tt(T, cap=32):
    """Largest divisor of T that is <= cap (timesteps per grid iteration)."""
    if T <= cap:
        return T
    for d in range(cap, 0, -1):
        if T % d == 0:
            return d
    return 1


def _log_softmax(logits, valid_cols):
    """Stable log_softmax over last axis; mask padded lanes only when needed."""
    if valid_cols != logits.shape[-1]:          # static at trace time
        cols = jax.lax.broadcasted_iota(jnp.int32, logits.shape, logits.ndim - 1)
        logits = jnp.where(cols < valid_cols, logits, jnp.float32(-1e30))
    m = jnp.max(logits, axis=-1, keepdims=True)
    shifted = logits - m
    lse = jnp.log(jnp.sum(jnp.exp(shifted), axis=-1, keepdims=True))
    return shifted - lse


# ---------------------------------------------------------------------------
# Single-step kernel (exact analogue of RNN.forward).
# The two input-side matmuls are fused into one MXU push via [x | h] @ [Wi; Wh].
# ---------------------------------------------------------------------------
def rnn_step_kernel(xh_ref, w1_ref, b1_ref, wo_ref, bo_ref,
                    out_ref, newh_ref, *, out_size):
    pre = jnp.dot(xh_ref[...], w1_ref[...],
                  preferred_element_type=jnp.float32) + b1_ref[...]
    hidden = jnp.tanh(pre)                                   # f32 (Bp, Hp)
    logits = jnp.dot(hidden.astype(jnp.bfloat16), wo_ref[...],
                     preferred_element_type=jnp.float32) + bo_ref[...]
    out_ref[...] = _log_softmax(logits, out_size).astype(out_ref.dtype)
    newh_ref[...] = hidden.astype(newh_ref.dtype)


def rnn_step(params, x, h):
    """One RNN step: returns (log_probs (B,O), new_hidden (B,H))."""
    I, H, O = params["sizes"]
    Kp, Hp, Op = params["padded"]
    B = x.shape[0]
    Bp = _round_up(B, 8)

    xh = jnp.concatenate([x, h], axis=1)                     # (B, I+H)
    xh_p = _pad2(xh, Bp, Kp).astype(jnp.bfloat16)

    vmem = pl.BlockSpec(memory_space=pltpu.MemorySpace.VMEM)
    out_p, newh_p = pl.pallas_call(
        functools.partial(rnn_step_kernel, out_size=O),
        out_shape=(jax.ShapeDtypeStruct((Bp, Op), jnp.float32),
                   jax.ShapeDtypeStruct((Bp, Hp), jnp.float32)),
        in_specs=[vmem] * 5,
        out_specs=(vmem, vmem),
        compiler_params=pltpu.CompilerParams(
            vmem_limit_bytes=VMEM_LIMIT_BYTES),
    )(xh_p, params["w1"], params["b1"], params["wo"], params["bo"])
    return out_p[:B, :O], newh_p[:B, :H]


# ---------------------------------------------------------------------------
# Sequence recurrence kernel: ONLY h_t = tanh(xproj_t + h_{t-1} @ Wh).
# TT timesteps per grid iteration (inner unrolled loop); Wh stays resident.
# ---------------------------------------------------------------------------
def rnn_recurrence_kernel(xproj_ref, h0_ref, wh_ref,
                          hid_ref, hlast_ref, h_carry, *, tt):
    blk = pl.program_id(0)

    @pl.when(blk == 0)
    def _():
        h_carry[...] = h0_ref[...]

    def step(i, h):
        pre = xproj_ref[i] + jnp.dot(h.astype(jnp.bfloat16), wh_ref[...],
                                     preferred_element_type=jnp.float32)
        hidden = jnp.tanh(pre)
        hid_ref[i] = hidden
        return hidden

    h_final = jax.lax.fori_loop(0, tt, step, h_carry[...], unroll=True)
    h_carry[...] = h_final

    @pl.when(blk == pl.num_programs(0) - 1)
    def _():
        hlast_ref[...] = h_final.astype(hlast_ref.dtype)


# ---------------------------------------------------------------------------
# Output-head kernel (hoisted out of the recurrence, fully parallel):
# log_probs = log_softmax(hidden @ Wo + bo) over all T*Bp rows at once.
# ---------------------------------------------------------------------------
def head_kernel(h_ref, wo_ref, bo_ref, out_ref, *, out_size):
    logits = jnp.dot(h_ref[...].astype(jnp.bfloat16), wo_ref[...],
                     preferred_element_type=jnp.float32) + bo_ref[...]
    out_ref[...] = _log_softmax(logits, out_size).astype(out_ref.dtype)


def rnn_sequence(params, xs, h0):
    """Run T steps: xs (T,B,I) -> (log_probs (T,B,O), h_T (B,H))."""
    I, H, O = params["sizes"]
    _, Hp, Op = params["padded"]
    T, B, _ = xs.shape
    Bp = _round_up(B, 8)
    tt = _pick_tt(T)

    # Hoisted i2h: one large (T*Bp, I) x (I, Hp) matmul straight into the
    # padded layout (Wi / bi+bh are pre-padded to Hp; only batch padding here).
    xs_p = jnp.pad(xs, ((0, 0), (0, Bp - B), (0, 0)))
    xproj = (jnp.dot(xs_p.reshape(T * Bp, I).astype(jnp.bfloat16),
                     params["wi_p"], preferred_element_type=jnp.float32)
             + params["b_ih_p"]).reshape(T, Bp, Hp)
    h0_p = _pad2(h0, Bp, Hp)

    # --- serial recurrence (hidden states only) ---
    hid_p, hlast_p = pl.pallas_call(
        functools.partial(rnn_recurrence_kernel, tt=tt),
        out_shape=(jax.ShapeDtypeStruct((T, Bp, Hp), jnp.float32),
                   jax.ShapeDtypeStruct((Bp, Hp), jnp.float32)),
        grid_spec=pltpu.PrefetchScalarGridSpec(
            num_scalar_prefetch=0,
            grid=(T // tt,),
            in_specs=[
                pl.BlockSpec((tt, Bp, Hp), lambda b: (b, 0, 0)),  # xproj block
                pl.BlockSpec((Bp, Hp), lambda b: (0, 0)),         # h0 (resident)
                pl.BlockSpec((Hp, Hp), lambda b: (0, 0)),         # Wh (resident)
            ],
            out_specs=[
                pl.BlockSpec((tt, Bp, Hp), lambda b: (b, 0, 0)),  # hiddens block
                pl.BlockSpec((Bp, Hp), lambda b: (0, 0)),         # final hidden
            ],
            scratch_shapes=[pltpu.VMEM((Bp, Hp), jnp.float32)],   # hidden carry
        ),
        compiler_params=pltpu.CompilerParams(
            dimension_semantics=("arbitrary",),                   # true recurrence
            vmem_limit_bytes=VMEM_LIMIT_BYTES),
    )(xproj, h0_p, params["wh"])

    # --- hoisted output head: one big parallel matmul + log_softmax ---
    rows = T * Bp                                   # always a multiple of 8
    rb = min(256, rows)                             # rows per MXU push
    rows_p = _round_up(rows, rb)
    hid_flat = hid_p.reshape(rows, Hp)
    if rows_p != rows:
        hid_flat = jnp.pad(hid_flat, ((0, rows_p - rows), (0, 0)))

    out_flat = pl.pallas_call(
        functools.partial(head_kernel, out_size=O),
        out_shape=jax.ShapeDtypeStruct((rows_p, Op), jnp.float32),
        grid_spec=pltpu.PrefetchScalarGridSpec(
            num_scalar_prefetch=0,
            grid=(rows_p // rb,),
            in_specs=[
                pl.BlockSpec((rb, Hp), lambda r: (r, 0)),   # hidden rows
                pl.BlockSpec((Hp, Op), lambda r: (0, 0)),   # Wo (resident)
                pl.BlockSpec((1, Op), lambda r: (0, 0)),    # bo (resident)
            ],
            out_specs=pl.BlockSpec((rb, Op), lambda r: (r, 0)),
        ),
        compiler_params=pltpu.CompilerParams(
            dimension_semantics=("parallel",),               # megacore-shardable
            vmem_limit_bytes=VMEM_LIMIT_BYTES),
    )(hid_flat, params["wo"], params["bo"])

    out = out_flat[:rows].reshape(T, Bp, Op)[:, :B, :O]
    return out, hlast_p[:B, :H]


# ---------------------------------------------------------------------------
# Parameter construction.
# ---------------------------------------------------------------------------
def init_linear_params(key, fan_in, fan_out):
    """nn.Linear-style U(-1/sqrt(fan_in), 1/sqrt(fan_in)); W is (fan_in, fan_out)."""
    kw, kb = jax.random.split(key)
    bound = 1.0 / jnp.sqrt(jnp.float32(fan_in))
    w = jax.random.uniform(kw, (fan_in, fan_out), jnp.float32, -bound, bound)
    b = jax.random.uniform(kb, (1, fan_out), jnp.float32, -bound, bound)
    return w, b


def prepare_params(wi, bi, wh, bh, wo, bo):
    """Pad to (8,128) tiles, fuse [Wi;Wh] + (bi+bh), cast matmul weights to bf16."""
    I, H = wi.shape
    O = wo.shape[1]
    Kp = _round_up(I + H, 128)     # fused [x|h] contraction dim (single-step path)
    Hp = _round_up(H, 128)
    Op = _round_up(O, 128)
    return {
        "sizes": (I, H, O),
        "padded": (Kp, Hp, Op),
        # fused path (single-step kernel)
        "w1": _pad2(jnp.concatenate([wi, wh], axis=0), Kp, Hp).astype(jnp.bfloat16),
        "b1": _pad2(bi + bh, 1, Hp),
        # split path (sequence: i2h hoisted & pre-padded, h2h resident)
        "wi_p": _pad2(wi, I, Hp).astype(jnp.bfloat16),
        "b_ih_p": _pad2(bi + bh, 1, Hp),
        "wh": _pad2(wh, Hp, Hp).astype(jnp.bfloat16),
        # output head
        "wo": _pad2(wo, Hp, Op).astype(jnp.bfloat16),
        "bo": _pad2(bo, 1, Op),
    }


if __name__ == "__main__":
    B = 2
    INPUT_SIZE = 16
    HIDDEN_SIZE = 32
    OUTPUT_SIZE = 8
    SEQ_LEN = 8

    key = jax.random.PRNGKey(0)
    k_x, k_xs, k_i2h, k_h2h, k_h2o = jax.random.split(key, 5)

    wi, bi = init_linear_params(k_i2h, INPUT_SIZE, HIDDEN_SIZE)
    wh, bh = init_linear_params(k_h2h, HIDDEN_SIZE, HIDDEN_SIZE)
    wo, bo = init_linear_params(k_h2o, HIDDEN_SIZE, OUTPUT_SIZE)
    params = prepare_params(wi, bi, wh, bh, wo, bo)

    # ---- single step (exact analogue of RNN.forward) ----
    x = jax.random.normal(k_x, (B, INPUT_SIZE), jnp.float32)
    h0 = jnp.zeros((B, HIDDEN_SIZE), jnp.float32)   # initHidden analogue (batched)

    out, new_h = rnn_step(params, x, h0)
    jax.block_until_ready((out, new_h))

    # bf16-matched pure-JAX reference
    wi_bf = wi.astype(jnp.bfloat16)
    wh_bf = wh.astype(jnp.bfloat16)
    wo_bf = wo.astype(jnp.bfloat16)

    def ref_step(xx, hh):
        pre = (jnp.dot(xx.astype(jnp.bfloat16), wi_bf, preferred_element_type=jnp.float32)
               + jnp.dot(hh.astype(jnp.bfloat16), wh_bf, preferred_element_type=jnp.float32)
               + bi + bh)
        hid = jnp.tanh(pre)
        logits = jnp.dot(hid.astype(jnp.bfloat16), wo_bf,
                         preferred_element_type=jnp.float32) + bo
        return jax.nn.log_softmax(logits, axis=1), hid

    ref_out, ref_h = ref_step(x, h0)
    assert jnp.allclose(out, ref_out, atol=2e-3), "single-step output mismatch"
    assert jnp.allclose(new_h, ref_h, atol=2e-3), "single-step hidden mismatch"

    # ---- fused sequence: recurrence kernel + hoisted output-head kernel ----
    xs = jax.random.normal(k_xs, (SEQ_LEN, B, INPUT_SIZE), jnp.float32)
    seq_out, seq_h = rnn_sequence(params, xs, h0)
    jax.block_until_ready((seq_out, seq_h))

    def ref_scan(carry, xx):
        o, hh = ref_step(xx, carry)
        return hh, o

    ref_hT, ref_outs = jax.lax.scan(ref_scan, h0, xs)
    assert jnp.allclose(seq_out, ref_outs, atol=2e-3), "sequence output mismatch"
    assert jnp.allclose(seq_h, ref_hT, atol=2e-3), "sequence hidden mismatch"

    print("KERNEL_OK")
</pallas_src>

<mosaic_0001>
module attributes {stable_mosaic.version = 11 : i64} {
  func.func @rnn_step_kernel(%arg0: memref<8x128xbf16, #tpu.memory_space<vmem>>, %arg1: memref<128x128xbf16, #tpu.memory_space<vmem>>, %arg2: memref<1x128xf32, #tpu.memory_space<vmem>>, %arg3: memref<128x128xbf16, #tpu.memory_space<vmem>>, %arg4: memref<1x128xf32, #tpu.memory_space<vmem>>, %arg5: memref<8x128xf32, #tpu.memory_space<vmem>>, %arg6: memref<8x128xf32, #tpu.memory_space<vmem>>) attributes {dimension_semantics = [], scalar_prefetch = 0 : i64, scratch_operands = 0 : i64, tpu.core_type = #tpu.core_type<tc>} {
    %c0 = arith.constant 0 : index
    %c0_0 = arith.constant 0 : index
    %0 = vector.load %arg0[%c0, %c0_0] : memref<8x128xbf16, #tpu.memory_space<vmem>>, vector<8x128xbf16>
    %c0_1 = arith.constant 0 : index
    %c0_2 = arith.constant 0 : index
    %1 = vector.load %arg1[%c0_1, %c0_2] : memref<128x128xbf16, #tpu.memory_space<vmem>>, vector<128x128xbf16>
    %cst = arith.constant dense<0.000000e+00> : vector<8x128xf32>
    %2 = tpu.matmul %0, %1, %cst {dimension_numbers = #tpu.dot_dimension_numbers<[1], [0], [0], [1], [0, 0, 1, 1], [], []>} : vector<8x128xbf16>, vector<128x128xbf16>, vector<8x128xf32> -> vector<8x128xf32>
    %c0_3 = arith.constant 0 : index
    %c0_4 = arith.constant 0 : index
    %3 = vector.load %arg2[%c0_3, %c0_4] : memref<1x128xf32, #tpu.memory_space<vmem>>, vector<1x128xf32>
    %4 = vector.broadcast %3 : vector<1x128xf32> to vector<8x128xf32>
    %5 = arith.addf %2, %4 : vector<8x128xf32>
    %6 = math.tanh %5 : vector<8x128xf32>
    %7 = arith.truncf %6 : vector<8x128xf32> to vector<8x128xbf16>
    %c0_5 = arith.constant 0 : index
    %c0_6 = arith.constant 0 : index
    %8 = vector.load %arg3[%c0_5, %c0_6] : memref<128x128xbf16, #tpu.memory_space<vmem>>, vector<128x128xbf16>
    %cst_7 = arith.constant dense<0.000000e+00> : vector<8x128xf32>
    %9 = tpu.matmul %7, %8, %cst_7 {dimension_numbers = #tpu.dot_dimension_numbers<[1], [0], [0], [1], [0, 0, 1, 1], [], []>} : vector<8x128xbf16>, vector<128x128xbf16>, vector<8x128xf32> -> vector<8x128xf32>
    %c0_8 = arith.constant 0 : index
    %c0_9 = arith.constant 0 : index
    %10 = vector.load %arg4[%c0_8, %c0_9] : memref<1x128xf32, #tpu.memory_space<vmem>>, vector<1x128xf32>
    %11 = vector.broadcast %10 : vector<1x128xf32> to vector<8x128xf32>
    %12 = arith.addf %9, %11 : vector<8x128xf32>
    %13 = tpu.iota {dimensions = array<i32: 1>} : vector<8x128xi32>
    %c8_i32 = arith.constant 8 : i32
    %14 = vector.broadcast %c8_i32 : i32 to vector<8x128xi32>
    %15 = arith.cmpi slt, %13, %14 : vector<8x128xi32>
    %cst_10 = arith.constant -1.000000e+30 : f32
    %16 = vector.broadcast %cst_10 : f32 to vector<8x128xf32>
    %17 = arith.select %15, %12, %16 : vector<8x128xi1>, vector<8x128xf32>
    %cst_11 = arith.constant dense<0xFF800000> : vector<8xf32>
    %18 = vector.multi_reduction <maximumf>, %17, %cst_11 [1] : vector<8x128xf32> to vector<8xf32>
    %19 = vector.shape_cast %18 : vector<8xf32> to vector<8x1xf32>
    %20 = vector.broadcast %19 : vector<8x1xf32> to vector<8x128xf32>
    %21 = arith.subf %17, %20 : vector<8x128xf32>
    %22 = math.exp %21 : vector<8x128xf32>
    %cst_12 = arith.constant dense<0.000000e+00> : vector<8xf32>
    %23 = vector.multi_reduction <add>, %22, %cst_12 [1] : vector<8x128xf32> to vector<8xf32>
    %24 = vector.shape_cast %23 : vector<8xf32> to vector<8x1xf32>
    %25 = math.log %24 : vector<8x1xf32>
    %26 = vector.broadcast %25 : vector<8x1xf32> to vector<8x128xf32>
    %27 = arith.subf %21, %26 : vector<8x128xf32>
    %c0_13 = arith.constant 0 : index
    %c0_14 = arith.constant 0 : index
    %28 = vector.load %arg5[%c0_13, %c0_14] : memref<8x128xf32, #tpu.memory_space<vmem>>, vector<8x128xf32>
    tpu.vector_store %arg5[%c0_13, %c0_14], %27 {strides = array<i32>} : memref<8x128xf32, #tpu.memory_space<vmem>>, vector<8x128xf32>,
    %c0_15 = arith.constant 0 : index
    %c0_16 = arith.constant 0 : index
    %29 = vector.load %arg6[%c0_15, %c0_16] : memref<8x128xf32, #tpu.memory_space<vmem>>, vector<8x128xf32>
    tpu.vector_store %arg6[%c0_15, %c0_16], %6 {strides = array<i32>} : memref<8x128xf32, #tpu.memory_space<vmem>>, vector<8x128xf32>,
    return
  }
}

</mosaic_0001>

<bundles_post_ra>
// kernel: tpu_custom_call.1
= control target key start
LH: loop header
LB: loop body
LE: loop exit
PB: predicated region body
PF: predicated region fallthrough
CT: control target
= control target key end

     0   :  { %12 = vsyncpa [#allocation3], 0  ;;  %s676_s0 = inlined_call_operand.hbm [shape: bf16[8,128], index: 0, kind: input, shape index: {}]   ;;  %s677_s1 = inlined_call_operand.hbm [shape: bf16[128,128], index: 1, kind: input, shape index: {}]   ;;  %s678_s2 = inlined_call_operand.vmem [shape: f32[1,128], index: 2, kind: input, shape index: {}]   ;;  %s679_s3 = inlined_call_operand.hbm [shape: bf16[128,128], index: 3, kind: input, shape index: {}]   ;;  %s680_s4 = inlined_call_operand.vmem [shape: f32[1,128], index: 4, kind: input, shape index: {}]   ;;  %s681_s5 = inlined_call_operand.hbm [shape: f32[8,128], index: 5, kind: output, shape index: {0}]   ;;  %s682_s6 = inlined_call_operand.hbm [shape: f32[8,128], index: 6, kind: output, shape index: {1}]  }
   0x1   :  { %13 = vsyncpa [#allocation6], 0 }
   0x2   :  { %14 = vsyncpa [#allocation4], 0 }
   0x3   :  { %15 = vsyncpa [#allocation10], 0  ;;  %s560_s21 = smov [#allocation5]   ;;  %s442_s25 = scalar_lea.hbm %s677_s1, 1024 }
   0x4   :  { %s31_s22 = sshll.u32 %s560_s21, 4  ;;  %p443_p0 = scmp.ne.s32.totalorder %s677_s1, %s442_s25  ;;  %s32_s22 = int_to_ptr.vmem [resolvable:$true] %s31_s22 }
   0x5   :  { %p446_p1 = scmp.lt.u32.totalorder %s442_s25, %s677_s1 }
   0x7   :  { %p448_p2 = pnand %p446_p1, %p443_p0 }
   0x9   :  { %451 = shalt.err (!%p448_p2)
}
   0xa   :  { %s452_s30 = scalar_lea.vmem %s32_s22, 1024  ;;  %p457_p4 = scmp.lt.s32.totalorder %s32_s22, %s32_s22 }
   0xb   :  { %p453_p3 = scmp.ne.s32.totalorder %s32_s22, %s452_s30  ;;  %p458_p5 = scmp.lt.s32.totalorder %s452_s30, %s452_s30 }
   0xd   :  { %p459_p6 = por %p458_p5, %p457_p4 }
   0xf   :  { %p460_p7 = pnand %p459_p6, %p453_p3 }
  0x11   :  { %463 = shalt.err (!%p460_p7)
}
  0x12   :  { %s561_s7 = smov 64   ;;  %s562_s8 = smov 4  }
  0x13   :  { %37 = dma.hbm_to_vmem [thread:$0]  %s677_s1, 1024, %s32_s22, [#allocation6], %s561_s7, %s561_s7, %s562_s8  }
  0x14   :  { %s563_s11 = smov [#allocation2]   ;;  %s564_s13 = smov [#allocation7]  }
  0x15   :  { %s22_s12 = sshll.u32 %s563_s11, 4  ;;  %s45_s14 = sshll.u32 %s564_s13, 4  ;;  %s23_s12 = int_to_ptr.vmem [resolvable:$true] %s22_s12  ;;  %s46_s14 = int_to_ptr.vmem [resolvable:$true] %s45_s14 }
  0x16   :  { %s464_s17 = scalar_lea.hbm %s676_s0, 64 }
  0x17   :  { %p465_p8 = scmp.ne.s32.totalorder %s676_s0, %s464_s17  ;;  %p468_p9 = scmp.lt.u32.totalorder %s464_s17, %s676_s0 }
  0x19   :  { %p470_p10 = pnand %p468_p9, %p465_p8 }
  0x1b   :  { %473 = shalt.err (!%p470_p10)
}
  0x1c   :  { %s474_s1 = scalar_lea.vmem %s23_s12, 64  ;;  %p479_p12 = scmp.lt.s32.totalorder %s23_s12, %s23_s12 }
  0x1d   :  { %p475_p11 = scmp.ne.s32.totalorder %s23_s12, %s474_s1  ;;  %p480_p13 = scmp.lt.s32.totalorder %s474_s1, %s474_s1 }
  0x1f   :  { %p481_p0 = por %p480_p13, %p479_p12 }
  0x21   :  { %p482_p1 = pnand %p481_p0, %p475_p11 }
  0x23   :  { %485 = shalt.err (!%p482_p1)
}
  0x24   :  { %25 = dma.hbm_to_vmem [thread:$0]  %s676_s0, 64, %s23_s12, [#allocation3]  }
  0x25   :  { %s486_s26 = scalar_lea.hbm %s679_s3, 1024 }
  0x26   :  { %p487_p2 = scmp.ne.s32.totalorder %s679_s3, %s486_s26  ;;  %p490_p3 = scmp.lt.u32.totalorder %s486_s26, %s679_s3 }
  0x28   :  { %p492_p4 = pnand %p490_p3, %p487_p2 }
  0x2a   :  { %495 = shalt.err (!%p492_p4)
}
  0x2b   :  { %s496_s9 = scalar_lea.vmem %s46_s14, 1024  ;;  %p501_p6 = scmp.lt.s32.totalorder %s46_s14, %s46_s14 }
  0x2c   :  { %p497_p5 = scmp.ne.s32.totalorder %s46_s14, %s496_s9  ;;  %p502_p7 = scmp.lt.s32.totalorder %s496_s9, %s496_s9 }
  0x2e   :  { %p503_p8 = por %p502_p7, %p501_p6 }
  0x30   :  { %p504_p9 = pnand %p503_p8, %p497_p5 }
  0x32   :  { %507 = shalt.err (!%p504_p9)
}
  0x33   :  { %51 = dma.hbm_to_vmem [thread:$0]  %s679_s3, 1024, %s46_s14, [#allocation6], %s561_s7, %s561_s7, %s562_s8  }
  0x34   :  { %552 = dma.done.wait [#allocation3], 64  }
  0x35   :  { %553 = vsyncadd [#allocation3], 4294967232 }
  0x36   :  { %554 = dma.done.wait [#allocation6], 2048  }
  0x37   :  { %555 = vsyncadd [#allocation6], 4294965248  ;;  %v565_v0 = vmov 0.0   ;;  %vm566_vm0 = vmmov 0   ;;  %v420_v1 = vld [vmem:[#allocation5] sm:$0xff]   ;;  %v421_v2 = vld [vmem:[#allocation5 + $0x8] sm:$0xff]   ;;  %v289_v26 = vlaneseq }
  0x38   :  { %371 = vmatprep.subr.bf16.mxu0 %v565_v0  ;;  %387 = vmatprep.mubr.msk.bf16.mxu0 %vm566_vm0, %v565_v0  ;;  %v422_v3 = vld [vmem:[#allocation5 + $0x10] sm:$0xff]   ;;  %v428_v4 = vld [vmem:[#allocation7] sm:$0xff]   ;;  %v423_v5 = vld [vmem:[#allocation5 + $0x18] sm:$0xff]  }
  0x39   :  { %391 = vmatprep.subr.bf16.mxu1 %v565_v0  ;;  %407 = vmatprep.mubr.msk.bf16.mxu1 %vm566_vm0, %v565_v0  ;;  %v429_v6 = vld [vmem:[#allocation7 + $0x8] sm:$0xff]   ;;  %v424_v7 = vld [vmem:[#allocation5 + $0x20] sm:$0xff]   ;;  %v430_v8 = vld [vmem:[#allocation7 + $0x10] sm:$0xff]   ;;  %v290_v27 = vand.u32 127, %v289_v26 }
  0x3a   :  { %372 = vmatpush3.bf16.msra.mxu0 %v420_v1  ;;  %392 = vmatpush3.bf16.msra.mxu1 %v428_v4  ;;  %v425_v9 = vld [vmem:[#allocation5 + $0x28] sm:$0xff]   ;;  %v431_v10 = vld [vmem:[#allocation7 + $0x18] sm:$0xff]   ;;  %v426_v11 = vld [vmem:[#allocation5 + $0x30] sm:$0xff]  }
  0x3b   :  { %373 = vmatprep.subr.bf16.mxu0 %v565_v0  ;;  %393 = vmatprep.subr.bf16.mxu1 %v565_v0  ;;  %v427_v12 = vld [vmem:[#allocation5 + $0x38] sm:$0xff]   ;;  %v432_v14 = vld [vmem:[#allocation7 + $0x20] sm:$0xff]   ;;  %v433_v15 = vld [vmem:[#allocation7 + $0x28] sm:$0xff]   ;;  %vm291_vm1 = vcmp.lt.s32.totalorder %v290_v27, 8 }
  0x3c   :  { %v64_v13 = vld [vmem:[#allocation2] sm:$0xf]  ;;  %v434_v16 = vld [vmem:[#allocation7 + $0x30] sm:$0xff]  }
  0x3d   :  { %v435_v17 = vld [vmem:[#allocation7 + $0x38] sm:$0xff]  }
  0x3e   :  { %374 = vmatpush3.bf16.msra.mxu0 %v421_v2  ;;  %394 = vmatpush3.bf16.msra.mxu1 %v429_v6  ;;  %v335_v18 = vld [vmem:[%s678_s2] ss:$0 sm:$0xff]  ;;  %s567_s2 = smov [#allocation9]  }
  0x3f   :  { %375 = vmatprep.subr.bf16.mxu0 %v565_v0  ;;  %395 = vmatprep.subr.bf16.mxu1 %v565_v0  ;;  %v344_v28 = vld [vmem:[%s680_s4] ss:$0 sm:$0xff]  ;;  %s321_s12 = sshll.u32 %s567_s2, 4  ;;  %s322_s12 = int_to_ptr.vmem [resolvable:$true] %s321_s12 }
  0x40   :  { %s508_s13 = scalar_lea.vmem %s322_s12, 128  ;;  %p513_p11 = scmp.lt.s32.totalorder %s322_s12, %s322_s12 }
  0x41   :  { %p509_p10 = scmp.ne.s32.totalorder %s322_s12, %s508_s13  ;;  %p514_p12 = scmp.lt.s32.totalorder %s508_s13, %s508_s13 }
  0x42   :  { %376 = vmatpush3.bf16.msra.mxu0 %v422_v3  ;;  %396 = vmatpush3.bf16.msra.mxu1 %v430_v8 }
  0x43   :  { %377 = vmatprep.subr.bf16.mxu0 %v565_v0  ;;  %397 = vmatprep.subr.bf16.mxu1 %v565_v0  ;;  %p515_p13 = por %p514_p12, %p513_p11 }
  0x45   :  { %p516_p0 = pnand %p515_p13, %p509_p10 }
  0x46   :  { %378 = vmatpush3.bf16.msra.mxu0 %v423_v5  ;;  %398 = vmatpush3.bf16.msra.mxu1 %v431_v10 }
  0x47   :  { %379 = vmatprep.subr.bf16.mxu0 %v565_v0  ;;  %399 = vmatprep.subr.bf16.mxu1 %v565_v0 }
  0x4a   :  { %380 = vmatpush3.bf16.msra.mxu0 %v424_v7  ;;  %400 = vmatpush3.bf16.msra.mxu1 %v432_v14 }
  0x4b   :  { %381 = vmatprep.subr.bf16.mxu0 %v565_v0  ;;  %401 = vmatprep.subr.bf16.mxu1 %v565_v0 }
  0x4e   :  { %382 = vmatpush3.bf16.msra.mxu0 %v425_v9  ;;  %402 = vmatpush3.bf16.msra.mxu1 %v433_v15 }
  0x4f   :  { %383 = vmatprep.subr.bf16.mxu0 %v565_v0  ;;  %403 = vmatprep.subr.bf16.mxu1 %v565_v0 }
  0x52   :  { %384 = vmatpush3.bf16.msra.mxu0 %v426_v11  ;;  %404 = vmatpush3.bf16.msra.mxu1 %v434_v16 }
  0x53   :  { %385 = vmatprep.subr.bf16.mxu0 %v565_v0  ;;  %405 = vmatprep.subr.bf16.mxu1 %v565_v0 }
  0x56   :  { %386 = vmatpush3.bf16.msra.mxu0 %v427_v12  ;;  %406 = vmatpush3.bf16.msra.mxu1 %v435_v17 }
  0x59   :  { %388 = vmatmul.mubr.bf16.vlgmr.msra.gmra.mrb[0].mxu0 %v64_v13 }
 0x12c   :  { %v170_v19 = vpop.f32.mrb[0].mxu0 }
 0x12d   :  { %v171_v20 = vadd.f32 %v335_v18, %v170_v19  ;;  %v389_v21 = vpop.f32.mrb[1].mxu0 }
 0x12e   :  { %v173_v22 = vpop.f32.mrb[2].mxu0 }
 0x12f   :  { %436 = vtanh.f32 %v171_v20  ;;  %v390_v23 = vpop.f32.mrb[3].mxu0 }
 0x139   :  { %v437_v24 = vpop.eup %436 }
 0x13a   :  { %304 = vst [vmem:[#allocation9] sm:$0xff] %v437_v24  ;;  %v177_v25 = vpack.c.bf16 %v437_v24, %v437_v24 }
 0x13c   :  { %408 = vmatmul.mubr.bf16.vlgmr.msra.gmra.mrb[0].mxu1 %v177_v25 }
 0x20f   :  { %v283_v29 = vpop.f32.mrb[0].mxu1 }
 0x210   :  { %v284_v30 = vadd.f32 %v344_v28, %v283_v29  ;;  %v409_v31 = vpop.f32.mrb[1].mxu1 }
 0x211   :  { %v286_v32 = vpop.f32.mrb[2].mxu1 }
 0x212   :  { %v410_v33 = vpop.f32.mrb[3].mxu1  ;;  %v292_v34 = vsel %vm291_vm1, %v284_v30, -1e+30 }
 0x213   :  { %293 = vmax.xlane.f32.xlu0 %v292_v34 }
 0x2a0   :  { %v294_v35 = vpop.xlane.xlu0 %293 }
 0x2a1   :  { %v295_v36 = vsub.f32 %v292_v34, %v294_v35 }
 0x2a3   :  { %v296_v37 = vmul.f32 1.442695, %v295_v36 }
 0x2a5   :  { %438 = vpow2.f32 %v296_v37 }
 0x2af   :  { %v439_v38 = vpop.eup %438 }
 0x2b0   :  { %298 = vadd.xlane.f32.xlu0 %v439_v38 }
 0x2b1   :  { %519 = shalt.err (!%p516_p0)
}
 0x2b2   :  { %s520_s15 = scalar_lea.hbm %s682_s6, 128 }
 0x2b3   :  { %p521_p1 = scmp.ne.s32.totalorder %s682_s6, %s520_s15  ;;  %p524_p2 = scmp.lt.u32.totalorder %s520_s15, %s682_s6 }
 0x2b5   :  { %p526_p3 = pnand %p524_p2, %p521_p1 }
 0x2b7   :  { %529 = shalt.err (!%p526_p3)
}
 0x2b8   :  { %324 = dma.vmem_to_hbm [thread:$0]  %s322_s12, 128, %s682_s6, [#allocation10]  }
 0x2b9   :  { %s568_s1 = smov [#allocation8]  }
 0x2ba   :  { %s311_s22 = sshll.u32 %s568_s1, 4  ;;  %s312_s22 = int_to_ptr.vmem [resolvable:$true] %s311_s22 }
 0x2bb   :  { %s530_s23 = scalar_lea.vmem %s312_s22, 128  ;;  %p535_p5 = scmp.lt.s32.totalorder %s312_s22, %s312_s22 }
 0x2bc   :  { %p531_p4 = scmp.ne.s32.totalorder %s312_s22, %s530_s23  ;;  %p536_p6 = scmp.lt.s32.totalorder %s530_s23, %s530_s23 }
 0x2be   :  { %p537_p7 = por %p536_p6, %p535_p5 }
 0x2c0   :  { %p538_p8 = pnand %p537_p7, %p531_p4 }
 0x33d   :  { %v299_v39 = vpop.xlane.xlu0 %298 }
 0x33e   :  { %440 = vlog2.f32 %v299_v39 }
 0x348   :  { %v441_v40 = vpop.eup %440 }
 0x349   :  { %v301_v41 = vmul.f32 0.6931472, %v441_v40 }
 0x34b   :  { %v302_v42 = vsub.f32 %v295_v36, %v301_v41 }
 0x34d   :  { %303 = vst [vmem:[#allocation8] sm:$0xff] %v302_v42 }
 0x34e   :  { %541 = shalt.err (!%p538_p8)
}
 0x34f   :  { %s542_s6 = scalar_lea.hbm %s681_s5, 128 }
 0x350   :  { %p543_p9 = scmp.ne.s32.totalorder %s681_s5, %s542_s6  ;;  %p546_p10 = scmp.lt.u32.totalorder %s542_s6, %s681_s5 }
 0x352   :  { %p548_p11 = pnand %p546_p10, %p543_p9 }
 0x354   :  { %551 = shalt.err (!%p548_p11)
}
 0x355   :  { %314 = dma.vmem_to_hbm [thread:$0]  %s312_s22, 128, %s681_s5, [#allocation4]  }
 0x356   :  { %556 = dma.done.wait [#allocation4], 128  }
 0x357   :  { %557 = vsyncadd [#allocation4], 4294967168 }
 0x358   :  { %558 = dma.done.wait [#allocation10], 128  }
 0x359   :  { %559 = vsyncadd [#allocation10], 4294967168 }
 0x35a   :  { %331 = vsyncpa [#allocation3], 1 }
 0x35b   :  { %332 = vsyncpa [#allocation6], 1 }
 0x35c   :  { %333 = vsyncpa [#allocation4], 1 }
 0x35d   :  { %334 = vsyncpa [#allocation10], 1 }

</bundles_post_ra>
